<compile_context>
chip_gen: v7x
topology: tpu7x:2x2x1
jax: 0.10.0
libtpu: 0.0.40
codegen_flags: <defaults>
</compile_context>

<pallas_src>
import functools

import jax
import jax.numpy as jnp
from jax import lax
from jax.experimental import pallas as pl
from jax.experimental.pallas import tpu as pltpu


def _round_up(n, m):
    return ((n + m - 1) // m) * m


def _residual_mlp_kernel(x_ref, w1_ref, b1_ref, w2_ref, b2_ref,
                         w3_ref, b3_ref, w4_ref, b4_ref, o_ref, *, chunk):
    # x_ref: (2, TB) feature-major batch tile (f32).  Weights/biases are full
    # arrays, VMEM-resident across the whole grid (constant index_map).
    tb = x_ref.shape[1]
    num_chunks = tb // chunk

    w1 = w1_ref[...]            # (64, 2)  f32  -> VPU broadcast-FMA path
    b1 = b1_ref[...]            # (64, 1)  f32
    w2 = w2_ref[...]            # (64, 64) bf16 -> MXU
    b2 = b2_ref[...]            # (64, 1)  f32
    w3 = w3_ref[...]            # (64, 64) bf16
    b3 = b3_ref[...]            # (64, 1)  f32
    w4 = w4_ref[...]            # (3, 64)  bf16
    b4 = b4_ref[...]            # (3, 1)   f32

    def body(c, carry):
        col = pl.multiple_of(c * chunk, 128)
        x = x_ref[:, pl.ds(col, chunk)]                      # (2, chunk) f32

        # Layer 1 (K=2): two FMAs on the VPU instead of an MXU pass.
        h1 = jnp.tanh(w1[:, 0:1] * x[0:1, :] + w1[:, 1:2] * x[1:2, :] + b1)

        # Layers 2-4: bf16 MXU operands, f32 accumulation + f32 bias/tanh.
        h2 = jnp.tanh(jnp.dot(w2, h1.astype(jnp.bfloat16),
                              preferred_element_type=jnp.float32) + b2)
        h3 = jnp.tanh(jnp.dot(w3, h2.astype(jnp.bfloat16),
                              preferred_element_type=jnp.float32) + b3) + h1
        out = jnp.dot(w4, h3.astype(jnp.bfloat16),
                      preferred_element_type=jnp.float32) + b4   # (3, chunk)

        o_ref[:, pl.ds(col, chunk)] = out.astype(o_ref.dtype)
        return carry

    # Unrolled fixed-trip loop -> LLO scheduler visibility, bounded live ranges.
    lax.fori_loop(0, num_chunks, body, 0, unroll=min(num_chunks, 8))


def residual_net_forward(x, params, *, tile_b=4096):
    """x: (N, 2) float32.  params: w1..w4 in PyTorch [out, in] layout, b1..b4 [out, 1]."""
    N = x.shape[0]
    n128 = _round_up(max(N, 1), 128)

    # Batch tile: multiple of 128 (lane width), capped at the padded batch.
    tb = min(_round_up(tile_b, 128), n128)
    # v7x megacore: guarantee >=2 grid steps when the batch is big enough so
    # the "parallel" batch axis actually shards across both TensorCores.
    if n128 >= 256:
        tb = min(tb, max(128, (n128 // 256) * 128))
    n_pad = _round_up(N, tb)

    # In-kernel lane sub-chunk (keeps the per-chunk layer chain in vregs).
    chunk = 256 if tb % 256 == 0 else 128

    # Feature-major slab with batch on the lane axis; padded columns are zeros
    # (they flow harmlessly through the MLP and are sliced off before return).
    x_fm = jnp.zeros((2, n_pad), jnp.float32).at[:, :N].set(x.T.astype(jnp.float32))

    w1 = params["w1"].astype(jnp.float32)
    b1 = params["b1"].astype(jnp.float32)
    # bf16 operands for the MXU (accumulation stays f32 inside the kernel).
    w2 = params["w2"].astype(jnp.bfloat16)
    w3 = params["w3"].astype(jnp.bfloat16)
    w4 = params["w4"].astype(jnp.bfloat16)
    b2 = params["b2"].astype(jnp.float32)
    b3 = params["b3"].astype(jnp.float32)
    b4 = params["b4"].astype(jnp.float32)

    def full(arr):
        # Full-array block, replicated across the batch grid (VMEM-resident).
        return pl.BlockSpec(arr.shape, lambda i: (0, 0))

    flops_per_row = 2 * (2 * 64 + 64 * 64 + 64 * 64 + 64 * 3) + 4 * 64 + 3
    weight_bytes = 4 * (64 * 2 + 4 * 64 + 3) + 2 * (2 * 64 * 64 + 3 * 64)
    cost = pl.CostEstimate(
        flops=flops_per_row * n_pad,
        transcendentals=3 * 64 * n_pad,
        bytes_accessed=(2 + 3) * 4 * n_pad + weight_bytes,
    )

    out_fm = pl.pallas_call(
        functools.partial(_residual_mlp_kernel, chunk=chunk),
        out_shape=jax.ShapeDtypeStruct((3, n_pad), jnp.float32),
        grid_spec=pltpu.PrefetchScalarGridSpec(
            num_scalar_prefetch=0,
            grid=(n_pad // tb,),
            in_specs=[
                pl.BlockSpec((2, tb), lambda i: (0, i)),   # x tile (lane-dense)
                full(w1), full(b1),
                full(w2), full(b2),
                full(w3), full(b3),
                full(w4), full(b4),
            ],
            out_specs=pl.BlockSpec((3, tb), lambda i: (0, i)),
        ),
        compiler_params=pltpu.CompilerParams(
            dimension_semantics=("parallel",)),
        cost_estimate=cost,
    )(x_fm, w1, b1, w2, b2, w3, b3, w4, b4)

    # TODO(synk): callers that already hold feature-major (2, N) data could skip
    # the transpose/pad + final slice/transpose HBM passes entirely.
    return out_fm[:, :N].T


def _xavier_uniform(key, fan_out, fan_in):
    # Matches torch.nn.init.xavier_uniform_ (gain=1): U(-a, a), a = sqrt(6/(fan_in+fan_out)).
    a = jnp.sqrt(6.0 / (fan_in + fan_out))
    return jax.random.uniform(key, (fan_out, fan_in), jnp.float32, -a, a)


def make_params(key):
    ks = jax.random.split(key, 8)
    dims = [(2, 64), (64, 64), (64, 64), (64, 3)]
    params = {}
    for idx, (fi, fo) in enumerate(dims, start=1):
        params[f"w{idx}"] = _xavier_uniform(ks[2 * (idx - 1)], fo, fi)
        # nn.Linear bias default init: U(-1/sqrt(fan_in), 1/sqrt(fan_in)); stored (out, 1).
        bound = 1.0 / jnp.sqrt(float(fi))
        params[f"b{idx}"] = jax.random.uniform(
            ks[2 * (idx - 1) + 1], (fo, 1), jnp.float32, -bound, bound)
    return params


def reference_forward(x, p):
    h1 = jnp.tanh(x @ p["w1"].T + p["b1"].T)
    h2 = jnp.tanh(h1 @ p["w2"].T + p["b2"].T)
    h3 = jnp.tanh(h2 @ p["w3"].T + p["b3"].T) + h1
    return h3 @ p["w4"].T + p["b4"].T


if __name__ == "__main__":
    key = jax.random.PRNGKey(0)
    pkey, xkey = jax.random.split(key)
    params = make_params(pkey)

    # Small batch consistent with the module's (N, 2) input; non-multiple of 128
    # exercises the padding / remainder path and gives a 2-step grid (megacore).
    N = 200
    x = jax.random.normal(xkey, (N, 2), jnp.float32)

    out = residual_net_forward(x, params)
    out = jax.block_until_ready(out)

    ref = reference_forward(x, params)
    assert out.shape == (N, 3)
    err = jnp.max(jnp.abs(out - ref))
    # bf16 MXU operands vs. the f32 reference -> loosened tolerance.
    assert jnp.allclose(out, ref, atol=5e-2, rtol=5e-2), f"max abs err {err}"
    print("KERNEL_OK")
</pallas_src>

<mosaic_0001>
module attributes {stable_mosaic.version = 11 : i64} {
  func.func @_residual_mlp_kernel(%arg0: i32, %arg1: memref<2x128xf32, #tpu.memory_space<vmem>>, %arg2: memref<64x2xf32, #tpu.memory_space<vmem>>, %arg3: memref<64x1xf32, #tpu.memory_space<vmem>>, %arg4: memref<64x64xbf16, #tpu.memory_space<vmem>>, %arg5: memref<64x1xf32, #tpu.memory_space<vmem>>, %arg6: memref<64x64xbf16, #tpu.memory_space<vmem>>, %arg7: memref<64x1xf32, #tpu.memory_space<vmem>>, %arg8: memref<3x64xbf16, #tpu.memory_space<vmem>>, %arg9: memref<3x1xf32, #tpu.memory_space<vmem>>, %arg10: memref<3x128xf32, #tpu.memory_space<vmem>>) attributes {dimension_semantics = [#tpu.dimension_semantics<parallel>], iteration_bounds = array<i64: 2>, scalar_prefetch = 0 : i64, scratch_operands = 0 : i64, tpu.core_type = #tpu.core_type<tc>, window_params = [{transform_indices = @transform_0, window_bounds = array<i64: 2, 128>}, {pipeline_mode = #tpu.pipeline_mode<synchronous>, transform_indices = @transform_1, window_bounds = array<i64: 64, 2>}, {pipeline_mode = #tpu.pipeline_mode<synchronous>, transform_indices = @transform_2, window_bounds = array<i64: 64, 1>}, {pipeline_mode = #tpu.pipeline_mode<synchronous>, transform_indices = @transform_3, window_bounds = array<i64: 64, 64>}, {pipeline_mode = #tpu.pipeline_mode<synchronous>, transform_indices = @transform_4, window_bounds = array<i64: 64, 1>}, {pipeline_mode = #tpu.pipeline_mode<synchronous>, transform_indices = @transform_5, window_bounds = array<i64: 64, 64>}, {pipeline_mode = #tpu.pipeline_mode<synchronous>, transform_indices = @transform_6, window_bounds = array<i64: 64, 1>}, {pipeline_mode = #tpu.pipeline_mode<synchronous>, transform_indices = @transform_7, window_bounds = array<i64: 3, 64>}, {pipeline_mode = #tpu.pipeline_mode<synchronous>, transform_indices = @transform_8, window_bounds = array<i64: 3, 1>}, {transform_indices = @transform_9, window_bounds = array<i64: 3, 128>}]} {
    %c0 = arith.constant 0 : index
    %c0_0 = arith.constant 0 : index
    %0 = vector.load %arg2[%c0, %c0_0] : memref<64x2xf32, #tpu.memory_space<vmem>>, vector<64x2xf32>
    %c0_1 = arith.constant 0 : index
    %c0_2 = arith.constant 0 : index
    %1 = vector.load %arg3[%c0_1, %c0_2] : memref<64x1xf32, #tpu.memory_space<vmem>>, vector<64x1xf32>
    %c0_3 = arith.constant 0 : index
    %c0_4 = arith.constant 0 : index
    %2 = vector.load %arg4[%c0_3, %c0_4] : memref<64x64xbf16, #tpu.memory_space<vmem>>, vector<64x64xbf16>
    %c0_5 = arith.constant 0 : index
    %c0_6 = arith.constant 0 : index
    %3 = vector.load %arg5[%c0_5, %c0_6] : memref<64x1xf32, #tpu.memory_space<vmem>>, vector<64x1xf32>
    %c0_7 = arith.constant 0 : index
    %c0_8 = arith.constant 0 : index
    %4 = vector.load %arg6[%c0_7, %c0_8] : memref<64x64xbf16, #tpu.memory_space<vmem>>, vector<64x64xbf16>
    %c0_9 = arith.constant 0 : index
    %c0_10 = arith.constant 0 : index
    %5 = vector.load %arg7[%c0_9, %c0_10] : memref<64x1xf32, #tpu.memory_space<vmem>>, vector<64x1xf32>
    %c0_11 = arith.constant 0 : index
    %c0_12 = arith.constant 0 : index
    %6 = vector.load %arg8[%c0_11, %c0_12] : memref<3x64xbf16, #tpu.memory_space<vmem>>, vector<3x64xbf16>
    %c0_13 = arith.constant 0 : index
    %c0_14 = arith.constant 0 : index
    %7 = vector.load %arg9[%c0_13, %c0_14] : memref<3x1xf32, #tpu.memory_space<vmem>>, vector<3x1xf32>
    %c0_i32 = arith.constant 0 : i32
    %c128_i32 = arith.constant 128 : i32
    %8 = arith.muli %c0_i32, %c128_i32 : i32
    %9 = tpu.assume_multiple %8, 128 : i32
    %c0_15 = arith.constant 0 : index
    %10 = arith.index_cast %9 : i32 to index
    %11 = vector.load %arg1[%c0_15, %10] : memref<2x128xf32, #tpu.memory_space<vmem>>, vector<2x128xf32>
    %12 = vector.extract_strided_slice %0 {offsets = [0, 0], sizes = [64, 1], strides = [1, 1]} : vector<64x2xf32> to vector<64x1xf32>
    %13 = vector.extract_strided_slice %11 {offsets = [0, 0], sizes = [1, 128], strides = [1, 1]} : vector<2x128xf32> to vector<1x128xf32>
    %14 = vector.broadcast %12 : vector<64x1xf32> to vector<64x128xf32>
    %15 = vector.broadcast %13 : vector<1x128xf32> to vector<64x128xf32>
    %16 = arith.mulf %14, %15 : vector<64x128xf32>
    %17 = vector.extract_strided_slice %0 {offsets = [0, 1], sizes = [64, 1], strides = [1, 1]} : vector<64x2xf32> to vector<64x1xf32>
    %18 = vector.extract_strided_slice %11 {offsets = [1, 0], sizes = [1, 128], strides = [1, 1]} : vector<2x128xf32> to vector<1x128xf32>
    %19 = vector.broadcast %17 : vector<64x1xf32> to vector<64x128xf32>
    %20 = vector.broadcast %18 : vector<1x128xf32> to vector<64x128xf32>
    %21 = arith.mulf %19, %20 : vector<64x128xf32>
    %22 = arith.addf %16, %21 : vector<64x128xf32>
    %23 = vector.broadcast %1 : vector<64x1xf32> to vector<64x128xf32>
    %24 = arith.addf %22, %23 : vector<64x128xf32>
    %25 = math.tanh %24 : vector<64x128xf32>
    %26 = arith.truncf %25 : vector<64x128xf32> to vector<64x128xbf16>
    %cst = arith.constant dense<0.000000e+00> : vector<64x128xf32>
    %27 = tpu.matmul %2, %26, %cst {dimension_numbers = #tpu.dot_dimension_numbers<[1], [0], [0], [1], [0, 0, 1, 1], [], []>} : vector<64x64xbf16>, vector<64x128xbf16>, vector<64x128xf32> -> vector<64x128xf32>
    %28 = vector.broadcast %3 : vector<64x1xf32> to vector<64x128xf32>
    %29 = arith.addf %27, %28 : vector<64x128xf32>
    %30 = math.tanh %29 : vector<64x128xf32>
    %31 = arith.truncf %30 : vector<64x128xf32> to vector<64x128xbf16>
    %cst_16 = arith.constant dense<0.000000e+00> : vector<64x128xf32>
    %32 = tpu.matmul %4, %31, %cst_16 {dimension_numbers = #tpu.dot_dimension_numbers<[1], [0], [0], [1], [0, 0, 1, 1], [], []>} : vector<64x64xbf16>, vector<64x128xbf16>, vector<64x128xf32> -> vector<64x128xf32>
    %33 = vector.broadcast %5 : vector<64x1xf32> to vector<64x128xf32>
    %34 = arith.addf %32, %33 : vector<64x128xf32>
    %35 = math.tanh %34 : vector<64x128xf32>
    %36 = arith.addf %35, %25 : vector<64x128xf32>
    %37 = arith.truncf %36 : vector<64x128xf32> to vector<64x128xbf16>
    %cst_17 = arith.constant dense<0.000000e+00> : vector<3x128xf32>
    %38 = tpu.matmul %6, %37, %cst_17 {dimension_numbers = #tpu.dot_dimension_numbers<[1], [0], [0], [1], [0, 0, 1, 1], [], []>} : vector<3x64xbf16>, vector<64x128xbf16>, vector<3x128xf32> -> vector<3x128xf32>
    %39 = vector.broadcast %7 : vector<3x1xf32> to vector<3x128xf32>
    %40 = arith.addf %38, %39 : vector<3x128xf32>
    %c0_18 = arith.constant 0 : index
    %41 = arith.index_cast %9 : i32 to index
    %42 = vector.load %arg10[%c0_18, %41] : memref<3x128xf32, #tpu.memory_space<vmem>>, vector<3x128xf32>
    tpu.vector_store %arg10[%c0_18, %41], %40 {strides = array<i32>} : memref<3x128xf32, #tpu.memory_space<vmem>>, vector<3x128xf32>,
    %c1_i32 = arith.constant 1 : i32
    return
  }
  func.func @transform_0(%arg0: i32) -> (i32, i32) {
    %c0_i32 = arith.constant 0 : i32
    %c0_i32_0 = arith.constant 0 : i32
    return %c0_i32, %arg0 : i32, i32
  }
  func.func @transform_1(%arg0: i32) -> (i32, i32) {
    %c0_i32 = arith.constant 0 : i32
    %c0_i32_0 = arith.constant 0 : i32
    %c0_i32_1 = arith.constant 0 : i32
    return %c0_i32, %c0_i32_0 : i32, i32
  }
  func.func @transform_2(%arg0: i32) -> (i32, i32) {
    %c0_i32 = arith.constant 0 : i32
    %c0_i32_0 = arith.constant 0 : i32
    %c0_i32_1 = arith.constant 0 : i32
    return %c0_i32, %c0_i32_0 : i32, i32
  }
  func.func @transform_3(%arg0: i32) -> (i32, i32) {
    %c0_i32 = arith.constant 0 : i32
    %c0_i32_0 = arith.constant 0 : i32
    %c0_i32_1 = arith.constant 0 : i32
    return %c0_i32, %c0_i32_0 : i32, i32
  }
  func.func @transform_4(%arg0: i32) -> (i32, i32) {
    %c0_i32 = arith.constant 0 : i32
    %c0_i32_0 = arith.constant 0 : i32
    %c0_i32_1 = arith.constant 0 : i32
    return %c0_i32, %c0_i32_0 : i32, i32
  }
  func.func @transform_5(%arg0: i32) -> (i32, i32) {
    %c0_i32 = arith.constant 0 : i32
    %c0_i32_0 = arith.constant 0 : i32
    %c0_i32_1 = arith.constant 0 : i32
    return %c0_i32, %c0_i32_0 : i32, i32
  }
  func.func @transform_6(%arg0: i32) -> (i32, i32) {
    %c0_i32 = arith.constant 0 : i32
    %c0_i32_0 = arith.constant 0 : i32
    %c0_i32_1 = arith.constant 0 : i32
    return %c0_i32, %c0_i32_0 : i32, i32
  }
  func.func @transform_7(%arg0: i32) -> (i32, i32) {
    %c0_i32 = arith.constant 0 : i32
    %c0_i32_0 = arith.constant 0 : i32
    %c0_i32_1 = arith.constant 0 : i32
    return %c0_i32, %c0_i32_0 : i32, i32
  }
  func.func @transform_8(%arg0: i32) -> (i32, i32) {
    %c0_i32 = arith.constant 0 : i32
    %c0_i32_0 = arith.constant 0 : i32
    %c0_i32_1 = arith.constant 0 : i32
    return %c0_i32, %c0_i32_0 : i32, i32
  }
  func.func @transform_9(%arg0: i32) -> (i32, i32) {
    %c0_i32 = arith.constant 0 : i32
    %c0_i32_0 = arith.constant 0 : i32
    return %c0_i32, %arg0 : i32, i32
  }
}

</mosaic_0001>

<bundles_post_ra>
// kernel: tpu_custom_call.1
= control target key start
LH: loop header
LB: loop body
LE: loop exit
PB: predicated region body
PF: predicated region fallthrough
CT: control target
= control target key end

     0   :  { %14 = vsyncpa [#allocation3], 0  ;;  %s1563_s0 = inlined_call_operand.vmem [shape: f32[2,256], index: 0, kind: input, shape index: {}]   ;;  %s1564_s1 = inlined_call_operand.vmem [shape: f32[64,2], index: 1, kind: input, shape index: {}]   ;;  %s1565_s2 = inlined_call_operand.vmem [shape: f32[64,1], index: 2, kind: input, shape index: {}]   ;;  %s1566_s3 = inlined_call_operand.vmem [shape: bf16[64,64], index: 3, kind: input, shape index: {}]   ;;  %s1567_s4 = inlined_call_operand.vmem [shape: f32[64,1], index: 4, kind: input, shape index: {}]   ;;  %s1568_s5 = inlined_call_operand.vmem [shape: bf16[64,64], index: 5, kind: input, shape index: {}]   ;;  %s1569_s6 = inlined_call_operand.vmem [shape: f32[64,1], index: 6, kind: input, shape index: {}]   ;;  %s1570_s7 = inlined_call_operand.vmem [shape: bf16[3,64], index: 7, kind: input, shape index: {}]   ;;  %s1571_s8 = inlined_call_operand.vmem [shape: f32[3,1], index: 8, kind: input, shape index: {}]   ;;  %s1572_s9 = inlined_call_operand.hbm [shape: f32[3,256], index: 9, kind: output, shape index: {}]  }
   0x1   :  { %16 = vsyncpa [#allocation3 + $0x1], 0  ;;  %s1293_s30 = smov 0   ;;  %s1295_s10 = smov 0  }
   0x2   :  { %s1297_s11 = smov 0   ;;  %s1299_s12 = smov 0  }
   0x3 LB: > { %s1314_s13 = sadd.s32 4294967295, %s1236_s12   ;;  %s973_s14 = sadd.s32 4294967294, %s1236_s12   ;;  %s1236_s12 = sphi %s1299_s12, %s1578_s12   ;;  %s1232_s11 = sphi %s1297_s11, %s1577_s11   ;;  %s1228_s10 = sphi %s1295_s10, %s1576_s10   ;;  %s1224_s30 = sphi %s1293_s30, %s1575_s30  }
   0x4   : > { %s1318_s15 = sadd.s32 1, %s1236_s12   ;;  %s223_s16 = sadd.s32 1, %s1232_s11 }
   0x5   : > { %s220_s17 = ssub.s32 %s1236_s12, %s1318_s15  ;;  %p233_p0 = scmp.ne.s32.totalorder %s1232_s11, %s1228_s10 }
   0x6   : > { %p221_p1 = scmp.eq.s32.totalorder %s220_s17, 0  ;;  %p234_p2 = scmp.eq.s32.totalorder %s1314_s13, 1 }
   0x7   : > { %p239_p3 = scmp.ne.s32.totalorder %s1228_s10, %s1224_s30  ;;  %p240_p4 = scmp.eq.s32.totalorder %s973_s14, 1 }
   0x8   : > { %s1329_s18 = scalar_select %p221_p1, %s1232_s11, %s223_s16  }
   0x9   : > { %p1331_p5 = por %p234_p2, %p233_p0  ;;  %p1335_p6 = por %p240_p4, %p239_p3 }
   0xa   : > { %p976_p7 = scmp.ge.s32.totalorder %s1236_s12, 1  ;;  %p289_p8 = scmp.lt.s32.totalorder %s1236_s12, 3 }
   0xc   : > { %p290_p9 = pnand %p976_p7, %p289_p8 }
   0xd   : > { %v331_v0 = vld [vmem:[%s1564_s1 + $0x10] sm:$0xff] (!%p290_p9)  ;;  %v329_v1 = vld [vmem:[%s1564_s1] sm:$0xff] (!%p290_p9)  ;;  %v1238_v2 = vmov (!%p290_p9), 1   ;;  %v330_v4 = vld [vmem:[%s1564_s1 + $0x8] sm:$0xff] (!%p290_p9)  ;;  %v1239_v7 = vmov (!%p290_p9), 0   ;;  %vm604_vm0 = vcmask (!%p290_p9), 523264   ;;  %v420_v38 = vlaneseq (!%p290_p9) }
   0xe   : > { %293 = sbr.rel (%p290_p9) target bundleno = 946 (0x3b2), region = 56  ;;  %1110 = vset.pattern.permute.xlu0 (!%p290_p9), %v1238_v2  ;;  %1108 = vset.pattern.permute.xlu1 (!%p290_p9), %v1238_v2  ;;  %v333_v3 = vld [vmem:[%s1564_s1 + $0x20] sm:$0xff] (!%p290_p9)  ;;  %v335_v5 = vld [vmem:[%s1564_s1 + $0x30] sm:$0xff] (!%p290_p9)  ;;  %v332_v6 = vld [vmem:[%s1564_s1 + $0x18] sm:$0xff] (!%p290_p9)  ;;  %p324_p10 = scmp.lt.s32.totalorder (!%p290_p9), %s1314_s13, 1  ;;  %vm1241_vm1 = vmmov (!%p290_p9), 0  }
   0xf   : > { %441 = vperm.xlu0 (!%p290_p9), %1110, %v331_v0   ;;  %433 = vperm.xlu1 (!%p290_p9), %1108, %v329_v1   ;;  %v337_v8 = vld [vmem:[%s1565_s2] sm:$0xff] (!%p290_p9)  ;;  %v338_v9 = vld [vmem:[%s1565_s2 + $0x8] sm:$0xff] (!%p290_p9)  ;;  %v340_v11 = vld [vmem:[%s1565_s2 + $0x18] sm:$0xff] (!%p290_p9)  ;;  %v421_v41 = vshrl.u32 (!%p290_p9), %v420_v38, 7  ;;  %s321_s26 = sand.u32 (!%p290_p9), 1, %s1228_s10   ;;  %s997_s28 = sshll.u32 (!%p290_p9), %s1314_s13, 6 }
  0x10   : > { %v334_v10 = vld [vmem:[%s1564_s1 + $0x28] sm:$0xff] (!%p290_p9)  ;;  %v353_v13 = vld [vmem:[%s1567_s4] sm:$0xff] (!%p290_p9)  ;;  %v339_v14 = vld [vmem:[%s1565_s2 + $0x10] sm:$0xff] (!%p290_p9)  ;;  %s977_s27 = sshll.u32 (!%p290_p9), %s321_s26, 2  ;;  %s1242_s23 = smov (!%p290_p9), [#allocation2]  }
  0x11   : > { %v342_v12 = vld [vmem:[%s1565_s2 + $0x28] sm:$0xff] (!%p290_p9)  ;;  %v355_v15 = vld [vmem:[%s1567_s4 + $0x10] sm:$0xff] (!%p290_p9)  ;;  %v357_v16 = vld [vmem:[%s1567_s4 + $0x20] sm:$0xff] (!%p290_p9)  ;;  %v466_v44 = vsub.s32 (!%p290_p9), 1, %v421_v41  ;;  %v422_v45 = vsub.s32 (!%p290_p9), 0, %v421_v41  ;;  %s1178_s24 = sshll.u32 (!%p290_p9), %s1242_s23, 4  ;;  %s1179_s24 = int_to_ptr.vmem [resolvable:$false] %s1178_s24 }
  0x12   : > { %v336_v17 = vld [vmem:[%s1564_s1 + $0x38] sm:$0xff] (!%p290_p9)  ;;  %v359_v18 = vld [vmem:[%s1567_s4 + $0x30] sm:$0xff] (!%p290_p9)  ;;  %v369_v19 = vld [vmem:[%s1569_s6] sm:$0xff] (!%p290_p9)  ;;  %s1180_s25 = scalar_lea.vmem (!%p290_p9), %s1179_s24, 128 }
  0x13   : > { %449 = vperm.xlu0 (!%p290_p9), %1110, %v333_v3   ;;  %437 = vperm.xlu1 (!%p290_p9), %1108, %v330_v4   ;;  %v341_v20 = vld [vmem:[%s1565_s2 + $0x20] sm:$0xff] (!%p290_p9)  ;;  %v371_v21 = vld [vmem:[%s1569_s6 + $0x10] sm:$0xff] (!%p290_p9)  ;;  %v344_v24 = vld [vmem:[%s1565_s2 + $0x38] sm:$0xff] (!%p290_p9) }
  0x14   : > { %v343_v22 = vld [vmem:[%s1565_s2 + $0x30] sm:$0xff] (!%p290_p9)  ;;  %v373_v23 = vld [vmem:[%s1569_s6 + $0x20] sm:$0xff] (!%p290_p9)  ;;  %v354_v26 = vld [vmem:[%s1567_s4 + $0x8] sm:$0xff] (!%p290_p9) }
  0x15   : > { %v375_v25 = vld [vmem:[%s1569_s6 + $0x30] sm:$0xff]  ;;  %v378_v27 = vld [vmem:[%s1571_s8] sm:$0x7]  ;;  %v356_v28 = vld [vmem:[%s1567_s4 + $0x18] sm:$0xff]  ;;  %s325_s29 = scalar_select %p324_p10, %s1314_s13, 1 }
  0x16   : > { %v358_v29 = vld [vmem:[%s1567_s4 + $0x28] sm:$0xff]  ;;  %v360_v30 = vld [vmem:[%s1567_s4 + $0x38] sm:$0xff]  ;;  %v1118_v31 = vld [vmem:[%s1566_s3] sm:$0xff]   ;;  %s901_s13 = scalar_lea.sflag [#allocation3], %s321_s26 }
  0x17   : > { %457 = vperm.xlu0 %1110, %v335_v5   ;;  %1109 = vset.pattern.permute.xlu1 %v1239_v7  ;;  %v370_v32 = vld [vmem:[%s1569_s6 + $0x8] sm:$0xff]  ;;  %v372_v33 = vld [vmem:[%s1569_s6 + $0x18] sm:$0xff]  ;;  %s978_s14 = sshll.u32 %s325_s29, 1  ;;  %s323_s29 = scalar_lea.vmem [#allocation2], %s977_s27 }
  0x18   : > { %397 = vperm.xlu1 %1109, %v332_v6   ;;  %1029 = vmatprep.mubr.msk.bf16.mxu0 %vm604_vm0, %v1118_v31  ;;  %v374_v34 = vld [vmem:[%s1569_s6 + $0x28] sm:$0xff]  ;;  %v376_v35 = vld [vmem:[%s1569_s6 + $0x38] sm:$0xff]  ;;  %s327_s21 = scalar_lea.vmem %s1563_s0, %s978_s14  ;;  %s914_s14 = sshll.u32 %s323_s29, 4  ;;  %s1523_s14 = int_to_ptr.vmem [resolvable:$true] %s914_s14 }
  0x19   : > { %v379_v46 = vld [vmem:[%s327_s21] sm:$0x3]  ;;  %s1521_s21 = scalar_lea.hbm %s1572_s9, %s997_s28  ;;  %s1174_s22 = scalar_lea.vmem %s1523_s14, 64 }
  0x1a   : > { %v467_v49 = vrot.slane %v379_v46, %v466_v44  ;;  %v423_v50 = vrot.slane %v379_v46, %v422_v45  ;;  %p1175_p11 = scmp.ne.s32.totalorder %s1523_s14, %s1174_s22  ;;  %p1181_p0 = scmp.lt.s32.totalorder %s1523_s14, %s1179_s24 }
  0x1b   : > { %1115 = vset.pattern.permute.xlu0 %v1239_v7  ;;  %p1182_p1 = scmp.lt.s32.totalorder %s1180_s25, %s1174_s22 }
  0x1c   : > { %382 = vperm.xlu0 %1115, %v329_v1   ;;  %1111 = vset.pattern.permute.xlu1 %v1238_v2  ;;  %p1176_p12 = pnand %p1175_p11, %p1331_p5 }
  0x1d   : > { %445 = vperm.xlu1 %1111, %v332_v6   ;;  %p1183_p2 = por %p1182_p1, %p1181_p0 }
  0x1e   : > { %p1177_p13 = pneg %p1176_p12 }
  0x20   : > { %387 = vperm.xlu0 %1115, %v330_v4   ;;  %p1184_p3 = pnand %p1183_p2, %p1177_p13 }
  0x21   : > { %1112 = vset.pattern.permute.xlu1 %v1239_v7 }
  0x22   : > { %486 = vperm.xlu1 %1112, %v337_v8  }
  0x24   : > { %392 = vperm.xlu0 %1115, %v331_v0  }
  0x26   : > { %402 = vperm.xlu1 %1112, %v333_v3  }
  0x28   : > { %491 = vperm.xlu0 %1115, %v338_v9  }
  0x2a   : > { %407 = vperm.xlu1 %1112, %v334_v10  }
  0x2c   : > { %501 = vperm.xlu0 %1115, %v340_v11  }
  0x2e   : > { %1113 = vset.pattern.permute.xlu1 %v1238_v2 }
  0x2f   : > { %453 = vperm.xlu1 %1113, %v334_v10  }
  0x30   : > { %511 = vperm.xlu0 %1115, %v342_v12  }
  0x33   : > { %1114 = vset.pattern.permute.xlu1 %v1239_v7 }
  0x34   : > { %546 = vperm.xlu0 %1115, %v353_v13   ;;  %496 = vperm.xlu1 %1114, %v339_v14  }
  0x38   : > { %556 = vperm.xlu0 %1115, %v355_v15   ;;  %412 = vperm.xlu1 %1114, %v335_v5  }
  0x3c   : > { %566 = vperm.xlu0 %1115, %v357_v16   ;;  %417 = vperm.xlu1 %1114, %v336_v17  }
  0x40   : > { %576 = vperm.xlu0 %1115, %v359_v18   ;;  %1116 = vset.pattern.permute.xlu1 %v1238_v2 }
  0x41   : > { %461 = vperm.xlu1 %1116, %v336_v17  }
  0x44   : > { %696 = vperm.xlu0 %1115, %v369_v19  }
  0x45   : > { %1117 = vset.pattern.permute.xlu1 %v1239_v7 }
  0x46   : > { %506 = vperm.xlu1 %1117, %v341_v20  }
  0x48   : > { %706 = vperm.xlu0 %1115, %v371_v21  }
  0x4a   : > { %516 = vperm.xlu1 %1117, %v343_v22  }
  0x4c   : > { %716 = vperm.xlu0 %1115, %v373_v23  }
  0x4e   : > { %521 = vperm.xlu1 %1117, %v344_v24  }
  0x50   : > { %726 = vperm.xlu0 %1115, %v375_v25  }
  0x52   : > { %551 = vperm.xlu1 %1117, %v354_v26  }
  0x54   : > { %853 = vperm.xlu0 %1115, %v378_v27  }
  0x56   : > { %561 = vperm.xlu1 %1117, %v356_v28  }
  0x5a   : > { %571 = vperm.xlu1 %1117, %v358_v29  }
  0x5e   : > { %581 = vperm.xlu1 %1117, %v360_v30  }
  0x62   : > { %701 = vperm.xlu1 %1117, %v370_v32  }
  0x66   : > { %711 = vperm.xlu1 %1117, %v372_v33  }
  0x6a   : > { %721 = vperm.xlu1 %1117, %v374_v34  }
  0x6e   : > { %731 = vperm.xlu1 %1117, %v376_v35  }
  0x8e   : > { %v434_v36 = vpop.permute.xlu1 %433  ;;  %v442_v37 = vpop.permute.xlu0 %441 }
  0x8f   : > { %v468_v53 = vmul.f32 %v467_v49, %v434_v36  ;;  %v470_v3 = vmul.f32 %v467_v49, %v442_v37 }
  0x92   : > { %v438_v39 = vpop.permute.xlu1 %437  ;;  %v450_v40 = vpop.permute.xlu0 %449 }
  0x93   : > { %v469_v58 = vmul.f32 %v467_v49, %v438_v39  ;;  %v472_v22 = vmul.f32 %v467_v49, %v450_v40 }
  0x96   : > { %v1446_v42 = vpop.permute.xlu0 %457 }
  0x97   : > { %v398_v43 = vpop.permute.xlu1 %397  ;;  %v474_v32 = vmul.f32 %v467_v49, %v1446_v42 }
  0x98   : > { %v427_v2 = vmul.f32 %v423_v50, %v398_v43 }
  0x9b   : > { %v383_v47 = vpop.permute.xlu0 %382 }
  0x9c   : > { %v446_v48 = vpop.permute.xlu1 %445  ;;  %v424_v51 = vmul.f32 %v423_v50, %v383_v47  ;;  %v1119_v47 = vld [vmem:[%s1566_s3 + $0x8] sm:$0xff]  }
  0x9d   : > { %v471_v1 = vmul.f32 %v467_v49, %v446_v48  ;;  %v1120_v48 = vld [vmem:[%s1566_s3 + $0x10] sm:$0xff]  }
  0x9e   : > { %v476_v56 = vadd.f32 %v468_v53, %v424_v51 }
  0x9f   : > { %v388_v52 = vpop.permute.xlu0 %387  ;;  %v479_v7 = vadd.f32 %v471_v1, %v427_v2 }
  0xa0   : > { %v425_v55 = vmul.f32 %v423_v50, %v388_v52 }
  0xa1   : > { %v487_v54 = vpop.permute.xlu1 %486 }
  0xa2   : > { %v524_v59 = vadd.f32 %v487_v54, %v476_v56  ;;  %v477_v61 = vadd.f32 %v469_v58, %v425_v55 }
  0xa3   : > { %v393_v57 = vpop.permute.xlu0 %392 }
  0xa4   : > { %1126 = vtanh.f32 %v524_v59  ;;  %v426_v4 = vmul.f32 %v423_v50, %v393_v57 }
  0xa5   : > { %v403_v60 = vpop.permute.xlu1 %402 }
  0xa6   : > { %v478_v9 = vadd.f32 %v470_v3, %v426_v4  ;;  %v428_v23 = vmul.f32 %v423_v50, %v403_v60 }
  0xa7   : > { %v492_v62 = vpop.permute.xlu0 %491 }
  0xa8   : > { %v525_v63 = vadd.f32 %v492_v62, %v477_v61  ;;  %v480_v28 = vadd.f32 %v472_v22, %v428_v23 }
  0xa9   : > { %v408_v0 = vpop.permute.xlu1 %407 }
  0xaa   : > { %1128 = vtanh.f32 %v525_v63  ;;  %v429_v18 = vmul.f32 %v423_v50, %v408_v0 }
  0xab   : > { %v502_v5 = vpop.permute.xlu0 %501 }
  0xac   : > { %v527_v8 = vadd.f32 %v502_v5, %v479_v7 }
  0xae   : > { %v454_v6 = vpop.permute.xlu1 %453  ;;  %v1451_v10 = vpop.eup %1126  ;;  %1130 = vtanh.f32 %v527_v8 }
  0xaf   : > { %v473_v16 = vmul.f32 %v467_v49, %v454_v6  ;;  %v512_v26 = vpop.permute.xlu0 %511 }
  0xb1   : > { %v481_v20 = vadd.f32 %v473_v16, %v429_v18 }
  0xb3   : > { %v497_v11 = vpop.permute.xlu1 %496  ;;  %v529_v27 = vadd.f32 %v512_v26, %v481_v20  ;;  %v547_v51 = vpop.permute.xlu0 %546 }
  0xb4   : > { %v1453_v12 = vpop.eup %1128  ;;  %v526_v13 = vadd.f32 %v497_v11, %v478_v9 }
  0xb5   : > { %v540_v14 = vpack.c.bf16 %v1453_v12, %v1451_v10 }
  0xb6   : > { %1132 = vtanh.f32 %v526_v13 }
  0xb7   : > { %v413_v15 = vpop.permute.xlu1 %412  ;;  %1021 = vmatprep.subr.bf16.mxu0 %v540_v14  ;;  %1134 = vtanh.f32 %v529_v27  ;;  %v557_v53 = vpop.permute.xlu0 %556  ;;  %v1123_v27 = vld [vmem:[%s1568_s5 + $0x8] sm:$0xff]  }
  0xb8   : > { %1022 = vmatpush3.bf16.msra.mxu0 %v540_v14  ;;  %v1457_v19 = vpop.eup %1130  ;;  %v430_v29 = vmul.f32 %v423_v50, %v413_v15 }
  0xba   : > { %v482_v35 = vadd.f32 %v474_v32, %v430_v29  ;;  %v1125_v29 = vld [vmem:[%s1568_s5 + $0x18] sm:$0xff]  }
  0xbb   : > { %v418_v17 = vpop.permute.xlu1 %417  ;;  %v567_v58 = vpop.permute.xlu0 %566 }
  0xbc   : > { %v431_v36 = vmul.f32 %v423_v50, %v418_v17  ;;  %v1122_v50 = vld [vmem:[%s1568_s5] sm:$0xff]  }
  0xbd   : > { %1045 = vmatprep.mubr.msk.bf16.mxu1 %vm604_vm0, %v1122_v50 }
  0xbf   : > { %v577_v1 = vpop.permute.xlu0 %576 }
  0xc0   : > { %v1459_v21 = vpop.eup %1132  ;;  %v462_v24 = vpop.permute.xlu1 %461 }
  0xc1   : > { %v541_v25 = vpack.c.bf16 %v1457_v19, %v1459_v21  ;;  %v475_v33 = vmul.f32 %v467_v49, %v462_v24  ;;  %v1464_v41 = vpop.eup %1134  ;;  %v1121_v49 = vld [vmem:[%s1566_s3 + $0x18] sm:$0xff]  }
  0xc3   : > { %1023 = vmatprep.subr.bf16.mxu0 %v541_v25  ;;  %v483_v38 = vadd.f32 %v475_v33, %v431_v36 }
  0xc4   : > { %1024 = vmatpush3.bf16.msra.mxu0 %v541_v25 }
  0xc5   : > { %v507_v30 = vpop.permute.xlu1 %506 }
  0xc6   : > { %v528_v31 = vadd.f32 %v507_v30, %v480_v28  ;;  %v1124_v28 = vld [vmem:[%s1568_s5 + $0x10] sm:$0xff]   ;;  %v1240_v30 = vmov 0.0  }
  0xc8   : > { %1136 = vtanh.f32 %v528_v31  ;;  %v697_v31 = vpop.permute.xlu0 %696 }
  0xc9   : > { %v517_v34 = vpop.permute.xlu1 %516 }
  0xca   : > { %v530_v37 = vadd.f32 %v517_v34, %v482_v35 }
  0xcc   : > { %1138 = vtanh.f32 %v530_v37  ;;  %v707_v33 = vpop.permute.xlu0 %706 }
  0xcd   : > { %v522_v39 = vpop.permute.xlu1 %521 }
  0xce   : > { %v531_v40 = vadd.f32 %v522_v39, %v483_v38 }
  0xd0   : > { %1140 = vtanh.f32 %v531_v40  ;;  %v717_v38 = vpop.permute.xlu0 %716 }
  0xd1   : > { %v552_v52 = vpop.permute.xlu1 %551 }
  0xd2   : > { %v1466_v43 = vpop.eup %1136 }
  0xd3   : > { %v542_v44 = vpack.c.bf16 %v1464_v41, %v1466_v43 }
  0xd5   : > { %1025 = vmatprep.subr.bf16.mxu0 %v542_v44  ;;  %v562_v54 = vpop.permute.xlu1 %561 }
  0xd6   : > { %1026 = vmatpush3.bf16.msra.mxu0 %v542_v44  ;;  %v1470_v42 = vpop.eup %1138 }
  0xd9   : > { %v572_v63 = vpop.permute.xlu1 %571 }
  0xda   : > { %v1472_v45 = vpop.eup %1140 }
  0xdb   : > { %v543_v46 = vpack.c.bf16 %v1472_v45, %v1470_v42 }
  0xdd   : > { %1027 = vmatprep.subr.bf16.mxu0 %v543_v46  ;;  %v582_v5 = vpop.permute.xlu1 %581 }
  0xde   : > { %1028 = vmatpush3.bf16.msra.mxu0 %v543_v46 }
  0xdf   : > { %1053 = vmatprep.subr.bf16.mxu0 %v1240_v30 }
  0xe1   : > { %1030 = vmatmul.mubr.msk.bf16.vlgmr.msra.gmra.mrb[0].mxu0 %vm604_vm0, %v1119_v47  ;;  %v702_v32 = vpop.permute.xlu1 %701 }
  0xe2   : > { %1033 = vmatprep.mubr.msk.bf16.mxu0 %vm604_vm0, %v1120_v48 }
  0xe5   : > { %v712_v34 = vpop.permute.xlu1 %711 }
  0xe9   : > { %1034 = vmatmul.mubr.msk.bf16.gmra.mrb[4].mxu0 %vm604_vm0, %v1121_v49  ;;  %v722_v47 = vpop.permute.xlu1 %721  ;;  %v727_v49 = vpop.permute.xlu0 %726 }
  0xea   : > { %1061 = vmatprep.mubr.msk.bf16.mxu0 %vm1241_vm1, %v1240_v30 }
 0x1b4   : > { %v1031_v55 = vpop.f32.mrb[0].mxu0 }
 0x1b5   : > { %v660_v56 = vadd.f32 %v1031_v55, %v557_v53  ;;  %v651_v57 = vpop.f32.mrb[1].mxu0  ;;  %v732_v53 = vpop.permute.xlu1 %731 }
 0x1b6   : > { %v652_v59 = vadd.f32 %v651_v57, %v547_v51  ;;  %v1032_v60 = vpop.f32.mrb[2].mxu0 }
 0x1b7   : > { %1142 = vtanh.f32 %v660_v56  ;;  %v663_v61 = vadd.f32 %v1032_v60, %v562_v54  ;;  %v654_v62 = vpop.f32.mrb[3].mxu0 }
 0x1b8   : > { %1144 = vtanh.f32 %v652_v59  ;;  %v655_v0 = vadd.f32 %v654_v62, %v552_v52 }
 0x1b9   : > { %1146 = vtanh.f32 %v663_v61 }
 0x1ba   : > { %1148 = vtanh.f32 %v655_v0 }
 0x1bc   : > { %v1035_v2 = vpop.f32.mrb[4].mxu0 }
 0x1bd   : > { %v676_v3 = vadd.f32 %v1035_v2, %v577_v1  ;;  %v667_v4 = vpop.f32.mrb[5].mxu0 }
 0x1be   : > { %v668_v6 = vadd.f32 %v667_v4, %v567_v58  ;;  %v1036_v7 = vpop.f32.mrb[6].mxu0 }
 0x1bf   : > { %1150 = vtanh.f32 %v676_v3  ;;  %v679_v8 = vadd.f32 %v1036_v7, %v582_v5  ;;  %v670_v9 = vpop.f32.mrb[7].mxu0 }
 0x1c0   : > { %1152 = vtanh.f32 %v668_v6  ;;  %v671_v11 = vadd.f32 %v670_v9, %v572_v63 }
 0x1c1   : > { %v1143_v13 = vpop.eup %1142  ;;  %1154 = vtanh.f32 %v679_v8 }
 0x1c2   : > { %v1145_v14 = vpop.eup %1144  ;;  %1156 = vtanh.f32 %v671_v11 }
 0x1c3   : > { %v1147_v15 = vpop.eup %1146 }
 0x1c4   : > { %v1149_v16 = vpop.eup %1148  ;;  %v691_v17 = vpack.c.bf16 %v1147_v15, %v1143_v13  ;;  %v377_v13 = vld [vmem:[%s1570_s7] sm:$0x3] }
 0x1c5   : > { %v690_v18 = vpack.c.bf16 %v1149_v16, %v1145_v14 }
 0x1c7   : > { %1037 = vmatprep.subr.bf16.mxu1 %v690_v18 }
 0x1c8   : > { %1038 = vmatpush3.bf16.msra.mxu1 %v690_v18 }
 0x1c9   : > { %v1151_v20 = vpop.eup %1150  ;;  %1039 = vmatprep.subr.bf16.mxu1 %v691_v17 }
 0x1ca   : > { %v1153_v22 = vpop.eup %1152 }
 0x1cb   : > { %v1155_v23 = vpop.eup %1154 }
 0x1cc   : > { %v1157_v24 = vpop.eup %1156  ;;  %1040 = vmatpush3.bf16.msra.mxu1 %v691_v17  ;;  %v693_v25 = vpack.c.bf16 %v1155_v23, %v1151_v20 }
 0x1cd   : > { %v692_v26 = vpack.c.bf16 %v1157_v24, %v1153_v22 }
 0x1cf   : > { %1041 = vmatprep.subr.bf16.mxu1 %v692_v26 }
 0x1d0   : > { %1042 = vmatpush3.bf16.msra.mxu1 %v692_v26 }
 0x1d1   : > { %1043 = vmatprep.subr.bf16.mxu1 %v693_v25 }
 0x1d4   : > { %1044 = vmatpush3.bf16.msra.mxu1 %v693_v25 }
 0x1d7   : > { %1046 = vmatmul.mubr.msk.bf16.vlgmr.msra.gmra.mrb[0].mxu1 %vm604_vm0, %v1123_v27 }
 0x1d8   : > { %1049 = vmatprep.mubr.msk.bf16.mxu1 %vm604_vm0, %v1124_v28 }
 0x1df   : > { %1050 = vmatmul.mubr.msk.bf16.gmra.mrb[4].mxu1 %vm604_vm0, %v1125_v29 }
 0x2aa   : > { %v1047_v35 = vpop.f32.mrb[0].mxu1 }
 0x2ab   : > { %v809_v36 = vadd.f32 %v1047_v35, %v707_v33  ;;  %v800_v37 = vpop.f32.mrb[1].mxu1 }
 0x2ac   : > { %v801_v39 = vadd.f32 %v800_v37, %v697_v31  ;;  %v1048_v40 = vpop.f32.mrb[2].mxu1 }
 0x2ad   : > { %1158 = vtanh.f32 %v809_v36  ;;  %v812_v44 = vadd.f32 %v1048_v40, %v712_v34  ;;  %v803_v46 = vpop.f32.mrb[3].mxu1 }
 0x2ae   : > { %1160 = vtanh.f32 %v801_v39  ;;  %v804_v48 = vadd.f32 %v803_v46, %v702_v32 }
 0x2af   : > { %1162 = vtanh.f32 %v812_v44 }
 0x2b0   : > { %1164 = vtanh.f32 %v804_v48 }
 0x2b2   : > { %v1051_v50 = vpop.f32.mrb[4].mxu1 }
 0x2b3   : > { %v825_v51 = vadd.f32 %v1051_v50, %v727_v49  ;;  %v816_v52 = vpop.f32.mrb[5].mxu1 }
 0x2b4   : > { %v817_v54 = vadd.f32 %v816_v52, %v717_v38  ;;  %v1052_v55 = vpop.f32.mrb[6].mxu1 }
 0x2b5   : > { %1166 = vtanh.f32 %v825_v51  ;;  %v828_v56 = vadd.f32 %v1052_v55, %v732_v53  ;;  %v819_v57 = vpop.f32.mrb[7].mxu1 }
 0x2b6   : > { %1168 = vtanh.f32 %v817_v54  ;;  %v820_v58 = vadd.f32 %v819_v57, %v722_v47 }
 0x2b7   : > { %v1159_v59 = vpop.eup %1158  ;;  %1170 = vtanh.f32 %v828_v56 }
 0x2b8   : > { %v1161_v60 = vpop.eup %1160  ;;  %1172 = vtanh.f32 %v820_v58  ;;  %v841_v63 = vadd.f32 %v1159_v59, %v1459_v21 }
 0x2b9   : > { %v1163_v61 = vpop.eup %1162  ;;  %v839_v1 = vadd.f32 %v1161_v60, %v1451_v10 }
 0x2ba   : > { %v1165_v62 = vpop.eup %1164  ;;  %v842_v0 = vadd.f32 %v1163_v61, %v1457_v19 }
 0x2bb   : > { %v840_v2 = vadd.f32 %v1165_v62, %v1453_v12 }
 0x2bc   : > { %v848_v3 = vpack.c.bf16 %v842_v0, %v841_v63 }
 0x2bd   : > { %v847_v4 = vpack.c.bf16 %v840_v2, %v839_v1 }
 0x2bf   : > { %v1167_v5 = vpop.eup %1166  ;;  %1054 = vmatpush3.bf16.msra.mxu0 %v847_v4 }
 0x2c0   : > { %v1169_v6 = vpop.eup %1168  ;;  %1055 = vmatprep.subr.bf16.mxu0 %v1240_v30  ;;  %v845_v9 = vadd.f32 %v1167_v5, %v1470_v42 }
 0x2c1   : > { %v1171_v7 = vpop.eup %1170  ;;  %v843_v19 = vadd.f32 %v1169_v6, %v1466_v43  ;;  %v854_v43 = vpop.permute.xlu0 %853 }
 0x2c2   : > { %v1173_v8 = vpop.eup %1172  ;;  %v846_v21 = vadd.f32 %v1171_v7, %v1472_v45 }
 0x2c3   : > { %1056 = vmatpush3.bf16.msra.mxu0 %v848_v3  ;;  %v844_v10 = vadd.f32 %v1173_v8, %v1464_v41 }
 0x2c4   : > { %1057 = vmatprep.subr.bf16.mxu0 %v1240_v30  ;;  %v850_v12 = vpack.c.bf16 %v846_v21, %v845_v9 }
 0x2c5   : > { %v849_v11 = vpack.c.bf16 %v844_v10, %v843_v19 }
 0x2c7   : > { %1058 = vmatpush3.bf16.msra.mxu0 %v849_v11 }
 0x2c8   : > { %1059 = vmatprep.subr.bf16.mxu0 %v1240_v30 }
 0x2cb   : > { %1060 = vmatpush3.bf16.msra.mxu0 %v850_v12 }
 0x2ce   : > { %1062 = vmatmul.mubr.msk.bf16.vlgmr.msra.gmra.mrb[8].mxu0 %vm604_vm0, %v377_v13 }
 0x3a1   : > { %v893_v41 = vpop.f32.mrb[8].mxu0 }
 0x3a2   : > { %v894_v42 = vadd.f32 %v893_v41, %v854_v43  ;;  %v1063_v45 = vpop.f32.mrb[9].mxu0 }
 0x3a3   : > { %v896_v14 = vpop.f32.mrb[10].mxu0 }
 0x3a4   : > { %899 = vst [vmem:[%s323_s29] sm:$0x7] %v894_v42  ;;  %v1064_v15 = vpop.f32.mrb[11].mxu0 }
 0x3a5   : > { %1187 = shalt.err (!%p1184_p3)
}
 0x3a6   : > { %s1188_s26 = scalar_lea.hbm %s1521_s21, 64  ;;  %s1192_s29 = scalar_lea.hbm %s1572_s9, 128 }
 0x3a7   : > { %p1189_p4 = scmp.ne.s32.totalorder %s1521_s21, %s1188_s26  ;;  %p1193_p9 = scmp.lt.u32.totalorder %s1521_s21, %s1572_s9 }
 0x3a8   : > { %p1194_p10 = scmp.lt.u32.totalorder %s1192_s29, %s1188_s26  ;;  %p1196_p12 = scmp.lt.u32.totalorder %s1188_s26, %s1521_s21 }
 0x3a9   : > { %p1190_p7 = pnand %p1189_p4, %p1331_p5 }
 0x3aa   : > { %p1195_p11 = por %p1194_p10, %p1193_p9 }
 0x3ab   : > { %p1191_p8 = pneg %p1190_p7 }
 0x3ac   : > { %p1197_p13 = por %p1196_p12, %p1195_p11 }
 0x3ae   : > { %p1198_p0 = pnand %p1197_p13, %p1191_p8 }
 0x3b0   : > { %1201 = shalt.err (!%p1198_p0)
}
 0x3b1   : > { %1065 = dma.vmem_to_hbm [thread:$0]  (%p1331_p5), %s1523_s14, 64, %s1521_s21, %s901_s13  }
 0x3b2 PF: > { %p1071_p1 = scmp.ge.s32.totalorder %s1236_s12, 2  ;;  %s926_s22 = sand.u32 1, %s1224_s30  }
 0x3b3   : > { %s927_s23 = scalar_lea.sflag [#allocation3], %s926_s22 }
 0x3b4   : > { %p1068_p2 = pnand %p1071_p1, %p1335_p6 }
 0x3b6   : > { %1219 = dma.done.wait (!%p1068_p2), %s927_s23, 64  }
 0x3b7   : > { %1221 = vsyncadd (!%p1068_p2), %s927_s23, 4294967232  ;;  %p19_p3 = scmp.ge.s32.totalorder %s1318_s15, 4   ;;  %s1575_s30 = smov %s1228_s10 }
 0x3b8   : > { %s1576_s10 = smov %s1232_s11  ;;  %s1577_s11 = smov %s1329_s18 }
 0x3b9   : > { %s1578_s12 = smov %s1318_s15  ;;  %21 = sbr.rel (!%p19_p3) target bundleno = 3 (0x3), region = 91 }
 0x3c0   :  { %932 = vsyncpa [#allocation3], 1 }
 0x3c1   :  { %934 = vsyncpa [#allocation3 + $0x1], 1 }

</bundles_post_ra>
